<compile_context>
chip_gen: v7x
topology: tpu7x:2x2x1
jax: 0.10.0
libtpu: 0.0.40
codegen_flags: <defaults>
</compile_context>

<pallas_src>
import jax
import jax.numpy as jnp
from jax import lax
from jax.experimental import pallas as pl
from jax.experimental.pallas import tpu as pltpu

EPS = 1e-6


def _round_up(x, m):
    return (x + m - 1) // m * m


def final_layer_kernel(x_ref, w_ref, b_ref, o_ref):
    """One batch tile: LayerNorm (no affine, eps=1e-6) over lanes, then x @ W + b."""
    x = x_ref[...].astype(jnp.float32)                        # [tile, c_model]
    inv_c = jnp.float32(1.0 / x.shape[-1])

    # Two-pass LN (matches PyTorch numerics; reductions run on the XLU lane axis).
    mu = jnp.sum(x, axis=-1, keepdims=True) * inv_c
    xc = x - mu
    var = jnp.sum(xc * xc, axis=-1, keepdims=True) * inv_c
    hn = xc * lax.rsqrt(var + EPS)

    # MXU matmul in the (pre-cast) weight dtype, f32 accumulation, bias add in f32.
    out = jnp.dot(hn.astype(w_ref.dtype), w_ref[...],
                  preferred_element_type=jnp.float32)
    out = out + b_ref[...].astype(jnp.float32)
    o_ref[...] = out.astype(o_ref.dtype)


def final_layer(x, w, b, *, tile_n=512, mxu_dtype=jnp.bfloat16, out_dtype=None):
    """x: [..., model_channels] (f32 or bf16). w: [model_channels, out_channels]
    (pre-transposed from PyTorch's [out, in]). b: [out_channels].
    Returns [..., out_channels] in `out_dtype` (default: x.dtype)."""
    *lead, c_model = x.shape
    c_out = w.shape[1]
    out_dtype = jnp.dtype(out_dtype) if out_dtype is not None else x.dtype

    # Flatten leading dims. NO channel padding: channel blocks below are full-extent,
    # so there is no extra HBM pass over x and no post-kernel slice of the output.
    xr = x.reshape(-1, c_model)
    n_rows = xr.shape[0]

    # Params: weight pre-cast to the MXU dtype (bf16 default), bias kept in f32.
    wp = w.astype(mxu_dtype)
    bp = b.astype(jnp.float32).reshape(1, c_out)

    x_bytes = xr.dtype.itemsize
    w_bytes = wp.dtype.itemsize
    o_bytes = jnp.dtype(out_dtype).itemsize

    # Per-generation VMEM cap (v7x only has 64 MiB physical VMEM; v5e/v6e 128 MiB).
    try:
        vmem_cap = int(pltpu.get_tpu_info().vmem_capacity_bytes) * 3 // 4
    except Exception:
        vmem_cap = 48 << 20

    # Batch tile: as large as tile_n / row count / VMEM budget allow (multiple of 8).
    param_bytes = c_model * c_out * w_bytes + c_out * 4
    headroom = 6 << 20
    per_row = (2 * c_model * x_bytes + 2 * c_out * o_bytes    # double-buffered x/out tiles
               + 4 * c_model * 4)                             # f32 LN intermediates (generous)
    max_tile = max(8, (vmem_cap - param_bytes - headroom) // per_row // 8 * 8)
    tile = max(8, min(_round_up(tile_n, 8), _round_up(n_rows, 8), max_tile))

    # v7x megacore: give the "parallel" grid at least 2 steps so both TCs get work.
    if pl.cdiv(n_rows, tile) < 2 and n_rows > 8:
        tile = _round_up(pl.cdiv(n_rows, 2), 8)
    grid = (pl.cdiv(n_rows, tile),)

    vmem_need = (2 * tile * c_model * x_bytes + 2 * tile * c_out * o_bytes
                 + 4 * tile * c_model * 4 + param_bytes + headroom)
    vmem_limit = int(min(vmem_cap, max(vmem_need, 16 << 20)))

    cost = pl.CostEstimate(
        flops=2 * n_rows * c_model * c_out + 6 * n_rows * c_model,
        transcendentals=n_rows,                               # one rsqrt per row
        bytes_accessed=(n_rows * c_model * x_bytes + c_model * c_out * w_bytes
                        + c_out * 4 + n_rows * c_out * o_bytes),
    )

    def build_call(single_buffer_params):
        # Grid-invariant weight/bias don't need double-buffering.
        param_kwargs = (
            {"pipeline_mode": pl.Buffered(1)} if single_buffer_params else {})
        return pl.pallas_call(
            final_layer_kernel,
            out_shape=jax.ShapeDtypeStruct((n_rows, c_out), out_dtype),
            grid_spec=pl.GridSpec(
                grid=grid,
                in_specs=[
                    pl.BlockSpec((tile, c_model), lambda i: (i, 0)),     # x tile
                    pl.BlockSpec((c_model, c_out), lambda i: (0, 0),     # weight (resident)
                                 **param_kwargs),
                    pl.BlockSpec((1, c_out), lambda i: (0, 0),           # bias (resident)
                                 **param_kwargs),
                ],
                out_specs=pl.BlockSpec((tile, c_out), lambda i: (i, 0)),
            ),
            compiler_params=pltpu.CompilerParams(
                dimension_semantics=("parallel",),
                vmem_limit_bytes=vmem_limit),
            cost_estimate=cost,
        )

    try:
        out = build_call(True)(xr, wp, bp)
    except Exception:
        # pl.Buffered(1) not supported on this JAX build; fall back to default
        # double-buffering of the grid-invariant params (correctness unchanged).
        out = build_call(False)(xr, wp, bp)

    return out.reshape(*lead, c_out)


def reference_forward(x, w, b):
    """Pure-JAX reference mirroring the PyTorch FinalLayer forward (f32 math)."""
    xf = x.astype(jnp.float32)
    mu = jnp.mean(xf, axis=-1, keepdims=True)
    var = jnp.mean(jnp.square(xf - mu), axis=-1, keepdims=True)
    xn = (xf - mu) * lax.rsqrt(var + EPS)
    return xn @ w.astype(jnp.float32) + b.astype(jnp.float32)


if __name__ == "__main__":
    # Small shapes consistent with the module: [batch, seq, model_channels].
    B, T = 2, 8
    MODEL_CHANNELS = 32
    OUT_CHANNELS = 16

    key = jax.random.PRNGKey(0)
    kx, kw, kb = jax.random.split(key, 3)
    x = jax.random.normal(kx, (B, T, MODEL_CHANNELS), jnp.float32)

    limit = (6.0 / (MODEL_CHANNELS + OUT_CHANNELS)) ** 0.5
    # Weight stored pre-transposed as [in, out] (PyTorch nn.Linear keeps [out, in]).
    w = jax.random.uniform(kw, (MODEL_CHANNELS, OUT_CHANNELS), jnp.float32, -limit, limit)
    b = 0.1 * jax.random.normal(kb, (OUT_CHANNELS,), jnp.float32)

    ref = reference_forward(x, w, b)

    # Exact path (f32 MXU inputs): matches PyTorch numerics tightly.
    out_f32 = jax.block_until_ready(final_layer(x, w, b, mxu_dtype=jnp.float32))
    assert out_f32.shape == (B, T, OUT_CHANNELS)
    assert jnp.allclose(out_f32, ref, atol=1e-5, rtol=1e-5), (
        f"f32 path max abs err {jnp.max(jnp.abs(out_f32 - ref))}")

    # Default fast path (bf16 MXU inputs, f32 accumulation): looser tolerance expected.
    out_bf = jax.block_until_ready(final_layer(x, w, b))
    assert out_bf.shape == (B, T, OUT_CHANNELS)
    assert jnp.allclose(out_bf, ref, atol=5e-2, rtol=5e-2), (
        f"bf16-MXU path max abs err {jnp.max(jnp.abs(out_bf - ref))}")

    print("KERNEL_OK")
</pallas_src>

<mosaic_0001>
module attributes {stable_mosaic.version = 11 : i64} {
  func.func @final_layer_kernel(%arg0: i32, %arg1: memref<8x32xf32, #tpu.memory_space<vmem>>, %arg2: memref<32x16xf32, #tpu.memory_space<vmem>>, %arg3: memref<1x16xf32, #tpu.memory_space<vmem>>, %arg4: memref<8x16xf32, #tpu.memory_space<vmem>>) attributes {dimension_semantics = [#tpu.dimension_semantics<parallel>], iteration_bounds = array<i64: 2>, scalar_prefetch = 0 : i64, scratch_operands = 0 : i64, tpu.core_type = #tpu.core_type<tc>, window_params = [{transform_indices = @transform_0, window_bounds = array<i64: 8, 32>}, {pipeline_mode = #tpu.pipeline_mode<synchronous>, transform_indices = @transform_1, window_bounds = array<i64: 32, 16>}, {pipeline_mode = #tpu.pipeline_mode<synchronous>, transform_indices = @transform_2, window_bounds = array<i64: 1, 16>}, {transform_indices = @transform_3, window_bounds = array<i64: 8, 16>}]} {
    %c0 = arith.constant 0 : index
    %c0_0 = arith.constant 0 : index
    %0 = vector.load %arg1[%c0, %c0_0] : memref<8x32xf32, #tpu.memory_space<vmem>>, vector<8x32xf32>
    %cst = arith.constant dense<0.000000e+00> : vector<8xf32>
    %1 = vector.multi_reduction <add>, %0, %cst [1] : vector<8x32xf32> to vector<8xf32>
    %2 = vector.shape_cast %1 : vector<8xf32> to vector<8x1xf32>
    %cst_1 = arith.constant 3.125000e-02 : f32
    %3 = vector.broadcast %cst_1 : f32 to vector<8x1xf32>
    %4 = arith.mulf %2, %3 : vector<8x1xf32>
    %5 = vector.broadcast %4 : vector<8x1xf32> to vector<8x32xf32>
    %6 = arith.subf %0, %5 : vector<8x32xf32>
    %7 = arith.mulf %6, %6 : vector<8x32xf32>
    %cst_2 = arith.constant dense<0.000000e+00> : vector<8xf32>
    %8 = vector.multi_reduction <add>, %7, %cst_2 [1] : vector<8x32xf32> to vector<8xf32>
    %9 = vector.shape_cast %8 : vector<8xf32> to vector<8x1xf32>
    %cst_3 = arith.constant 3.125000e-02 : f32
    %10 = vector.broadcast %cst_3 : f32 to vector<8x1xf32>
    %11 = arith.mulf %9, %10 : vector<8x1xf32>
    %cst_4 = arith.constant 9.99999997E-7 : f32
    %12 = vector.broadcast %cst_4 : f32 to vector<8x1xf32>
    %13 = arith.addf %11, %12 : vector<8x1xf32>
    %14 = math.rsqrt %13 : vector<8x1xf32>
    %15 = vector.broadcast %14 : vector<8x1xf32> to vector<8x32xf32>
    %16 = arith.mulf %6, %15 : vector<8x32xf32>
    %c0_5 = arith.constant 0 : index
    %c0_6 = arith.constant 0 : index
    %17 = vector.load %arg2[%c0_5, %c0_6] : memref<32x16xf32, #tpu.memory_space<vmem>>, vector<32x16xf32>
    %cst_7 = arith.constant dense<0.000000e+00> : vector<8x16xf32>
    %18 = tpu.matmul %16, %17, %cst_7 {dimension_numbers = #tpu.dot_dimension_numbers<[1], [0], [0], [1], [0, 0, 1, 1], [], []>} : vector<8x32xf32>, vector<32x16xf32>, vector<8x16xf32> -> vector<8x16xf32>
    %c0_8 = arith.constant 0 : index
    %c0_9 = arith.constant 0 : index
    %19 = vector.load %arg3[%c0_8, %c0_9] : memref<1x16xf32, #tpu.memory_space<vmem>>, vector<1x16xf32>
    %20 = vector.broadcast %19 : vector<1x16xf32> to vector<8x16xf32>
    %21 = arith.addf %18, %20 : vector<8x16xf32>
    %c0_10 = arith.constant 0 : index
    %c0_11 = arith.constant 0 : index
    %22 = vector.load %arg4[%c0_10, %c0_11] : memref<8x16xf32, #tpu.memory_space<vmem>>, vector<8x16xf32>
    tpu.vector_store %arg4[%c0_10, %c0_11], %21 {strides = array<i32>} : memref<8x16xf32, #tpu.memory_space<vmem>>, vector<8x16xf32>,
    return
  }
  func.func @transform_0(%arg0: i32) -> (i32, i32) {
    %c0_i32 = arith.constant 0 : i32
    %c0_i32_0 = arith.constant 0 : i32
    return %arg0, %c0_i32 : i32, i32
  }
  func.func @transform_1(%arg0: i32) -> (i32, i32) {
    %c0_i32 = arith.constant 0 : i32
    %c0_i32_0 = arith.constant 0 : i32
    %c0_i32_1 = arith.constant 0 : i32
    return %c0_i32, %c0_i32_0 : i32, i32
  }
  func.func @transform_2(%arg0: i32) -> (i32, i32) {
    %c0_i32 = arith.constant 0 : i32
    %c0_i32_0 = arith.constant 0 : i32
    %c0_i32_1 = arith.constant 0 : i32
    return %c0_i32, %c0_i32_0 : i32, i32
  }
  func.func @transform_3(%arg0: i32) -> (i32, i32) {
    %c0_i32 = arith.constant 0 : i32
    %c0_i32_0 = arith.constant 0 : i32
    return %arg0, %c0_i32 : i32, i32
  }
}

module attributes {stable_mosaic.version = 11 : i64} {
  func.func @final_layer_kernel(%arg0: i32, %arg1: memref<8x32xf32, #tpu.memory_space<vmem>>, %arg2: memref<32x16xf32, #tpu.memory_space<vmem>>, %arg3: memref<1x16xf32, #tpu.memory_space<vmem>>, %arg4: memref<8x16xf32, #tpu.memory_space<vmem>>) attributes {dimension_semantics = [#tpu.dimension_semantics<parallel>], iteration_bounds = array<i64: 2>, scalar_prefetch = 0 : i64, scratch_operands = 0 : i64, tpu.core_type = #tpu.core_type<tc>, window_params = [{transform_indices = @transform_0, window_bounds = array<i64: 8, 32>}, {pipeline_mode = #tpu.pipeline_mode<synchronous>, transform_indices = @transform_1, window_bounds = array<i64: 32, 16>}, {pipeline_mode = #tpu.pipeline_mode<synchronous>, transform_indices = @transform_2, window_bounds = array<i64: 1, 16>}, {transform_indices = @transform_3, window_bounds = array<i64: 8, 16>}]} {
    %c0 = arith.constant 0 : index
    %c0_0 = arith.constant 0 : index
    %0 = vector.load %arg1[%c0, %c0_0] : memref<8x32xf32, #tpu.memory_space<vmem>>, vector<8x32xf32>
    %cst = arith.constant dense<0.000000e+00> : vector<8xf32>
    %1 = vector.multi_reduction <add>, %0, %cst [1] : vector<8x32xf32> to vector<8xf32>
    %2 = vector.shape_cast %1 : vector<8xf32> to vector<8x1xf32>
    %cst_1 = arith.constant 3.125000e-02 : f32
    %3 = vector.broadcast %cst_1 : f32 to vector<8x1xf32>
    %4 = arith.mulf %2, %3 : vector<8x1xf32>
    %5 = vector.broadcast %4 : vector<8x1xf32> to vector<8x32xf32>
    %6 = arith.subf %0, %5 : vector<8x32xf32>
    %7 = arith.mulf %6, %6 : vector<8x32xf32>
    %cst_2 = arith.constant dense<0.000000e+00> : vector<8xf32>
    %8 = vector.multi_reduction <add>, %7, %cst_2 [1] : vector<8x32xf32> to vector<8xf32>
    %9 = vector.shape_cast %8 : vector<8xf32> to vector<8x1xf32>
    %cst_3 = arith.constant 3.125000e-02 : f32
    %10 = vector.broadcast %cst_3 : f32 to vector<8x1xf32>
    %11 = arith.mulf %9, %10 : vector<8x1xf32>
    %cst_4 = arith.constant 9.99999997E-7 : f32
    %12 = vector.broadcast %cst_4 : f32 to vector<8x1xf32>
    %13 = arith.addf %11, %12 : vector<8x1xf32>
    %14 = math.rsqrt %13 : vector<8x1xf32>
    %15 = vector.broadcast %14 : vector<8x1xf32> to vector<8x32xf32>
    %16 = arith.mulf %6, %15 : vector<8x32xf32>
    %c0_5 = arith.constant 0 : index
    %c0_6 = arith.constant 0 : index
    %17 = vector.load %arg2[%c0_5, %c0_6] : memref<32x16xf32, #tpu.memory_space<vmem>>, vector<32x16xf32>
    %cst_7 = arith.constant dense<0.000000e+00> : vector<8x16xf32>
    %18 = tpu.matmul %16, %17, %cst_7 {dimension_numbers = #tpu.dot_dimension_numbers<[1], [0], [0], [1], [0, 0, 1, 1], [], []>} : vector<8x32xf32>, vector<32x16xf32>, vector<8x16xf32> -> vector<8x16xf32>
    %c0_8 = arith.constant 0 : index
    %c0_9 = arith.constant 0 : index
    %19 = vector.load %arg3[%c0_8, %c0_9] : memref<1x16xf32, #tpu.memory_space<vmem>>, vector<1x16xf32>
    %20 = vector.broadcast %19 : vector<1x16xf32> to vector<8x16xf32>
    %21 = arith.addf %18, %20 : vector<8x16xf32>
    %c0_10 = arith.constant 0 : index
    %c0_11 = arith.constant 0 : index
    %22 = vector.load %arg4[%c0_10, %c0_11] : memref<8x16xf32, #tpu.memory_space<vmem>>, vector<8x16xf32>
    tpu.vector_store %arg4[%c0_10, %c0_11], %21 {strides = array<i32>} : memref<8x16xf32, #tpu.memory_space<vmem>>, vector<8x16xf32>,
    return
  }
  func.func @transform_0(%arg0: i32) -> (i32, i32) {
    %c0_i32 = arith.constant 0 : i32
    %c0_i32_0 = arith.constant 0 : i32
    return %arg0, %c0_i32 : i32, i32
  }
  func.func @transform_1(%arg0: i32) -> (i32, i32) {
    %c0_i32 = arith.constant 0 : i32
    %c0_i32_0 = arith.constant 0 : i32
    %c0_i32_1 = arith.constant 0 : i32
    return %c0_i32, %c0_i32_0 : i32, i32
  }
  func.func @transform_2(%arg0: i32) -> (i32, i32) {
    %c0_i32 = arith.constant 0 : i32
    %c0_i32_0 = arith.constant 0 : i32
    %c0_i32_1 = arith.constant 0 : i32
    return %c0_i32, %c0_i32_0 : i32, i32
  }
  func.func @transform_3(%arg0: i32) -> (i32, i32) {
    %c0_i32 = arith.constant 0 : i32
    %c0_i32_0 = arith.constant 0 : i32
    return %arg0, %c0_i32 : i32, i32
  }
}

</mosaic_0001>

<bundles_post_ra>
// kernel: tpu_custom_call.1
= control target key start
LH: loop header
LB: loop body
LE: loop exit
PB: predicated region body
PF: predicated region fallthrough
CT: control target
= control target key end

     0   :  { %8 = vsyncpa [#allocation3], 0  ;;  %s624_s0 = inlined_call_operand.vmem [shape: f32[16,32], index: 0, kind: input, shape index: {}]   ;;  %s625_s1 = inlined_call_operand.vmem [shape: f32[32,16], index: 1, kind: input, shape index: {}]   ;;  %s626_s2 = inlined_call_operand.vmem [shape: f32[1,16], index: 2, kind: input, shape index: {}]   ;;  %s627_s3 = inlined_call_operand.hbm [shape: f32[16,16], index: 3, kind: output, shape index: {}]  }
   0x1   :  { %10 = vsyncpa [#allocation3 + $0x1], 0  ;;  %s506_s12 = smov 0   ;;  %s508_s13 = smov 0  }
   0x2   :  { %s510_s14 = smov 0   ;;  %s512_s15 = smov 0  }
   0x3 LB: > { %s527_s16 = sadd.s32 4294967295, %s480_s15   ;;  %s340_s17 = sadd.s32 4294967294, %s480_s15   ;;  %s480_s15 = sphi %s512_s15, %s633_s15   ;;  %s476_s14 = sphi %s510_s14, %s632_s14   ;;  %s472_s13 = sphi %s508_s13, %s631_s13   ;;  %s468_s12 = sphi %s506_s12, %s630_s12  }
   0x4   : > { %s531_s18 = sadd.s32 1, %s480_s15   ;;  %s91_s19 = sadd.s32 1, %s476_s14 }
   0x5   : > { %s88_s20 = ssub.s32 %s480_s15, %s531_s18  ;;  %p101_p0 = scmp.ne.s32.totalorder %s476_s14, %s472_s13 }
   0x6   : > { %p89_p1 = scmp.eq.s32.totalorder %s88_s20, 0  ;;  %p102_p2 = scmp.eq.s32.totalorder %s527_s16, 1 }
   0x7   : > { %p107_p3 = scmp.ne.s32.totalorder %s472_s13, %s468_s12  ;;  %p108_p4 = scmp.eq.s32.totalorder %s340_s17, 1 }
   0x8   : > { %s542_s21 = scalar_select %p89_p1, %s476_s14, %s91_s19  }
   0x9   : > { %p544_p5 = por %p102_p2, %p101_p0  ;;  %p548_p6 = por %p108_p4, %p107_p3 }
   0xa   : > { %p343_p7 = scmp.ge.s32.totalorder %s480_s15, 1  ;;  %p139_p8 = scmp.lt.s32.totalorder %s480_s15, 3 }
   0xc   : > { %p140_p9 = pnand %p343_p7, %p139_p8 }
   0xd   : > { %p162_p10 = scmp.lt.s32.totalorder (!%p140_p9), %s527_s16, 1  ;;  %vm167_vm0 = vcmask (!%p140_p9), 261120   ;;  %v181_v7 = vld [vmem:[%s625_s1] sm:$0xff] (!%p140_p9)  ;;  %v182_v8 = vld [vmem:[%s625_s1 + $0x8] sm:$0xff] (!%p140_p9)  ;;  %v183_v9 = vld [vmem:[%s625_s1 + $0x10] sm:$0xff] (!%p140_p9)  ;;  %v482_v10 = vmov (!%p140_p9), 0.0|0.0  }
   0xe   : > { %143 = sbr.rel (%p140_p9) target bundleno = 563 (0x233), region = 32  ;;  %368 = vmatprep.subr.bf16.mxu0 (!%p140_p9), %v482_v10  ;;  %v369_v11 = vpack.c.bf16 (!%p140_p9), %v182_v8, %v181_v7  ;;  %v184_v12 = vld [vmem:[%s625_s1 + $0x18] sm:$0xff] (!%p140_p9)  ;;  %vm483_vm1 = vmmov (!%p140_p9), 0   ;;  %v484_v13 = vmov (!%p140_p9), 0.0   ;;  %s159_s10 = sand.u32 (!%p140_p9), 1, %s472_s13   ;;  %vm265_vm2 = vcmask (!%p140_p9), 130048  }
   0xf   : > { %365 = vmatprep.mubr.msk.f32.mxu0 (!%p140_p9), %vm483_vm1, %v484_v13  ;;  %v372_v14 = vpack.c.bf16 (!%p140_p9), %v184_v12, %v183_v9  ;;  %s344_s11 = sshll.u32 (!%p140_p9), %s159_s10, 3  ;;  %v346_v20 = vld [vmem:[%s626_s2] ss:$0 sm:$0xff] (!%p140_p9)  ;;  %s349_s20 = sshll.u32 (!%p140_p9), %s527_s16, 7 }
  0x10   : > { %370 = vmatpush3.bf16.msra.mxu0 (!%p140_p9), %v369_v11  ;;  %s268_s29 = scalar_lea.sflag (!%p140_p9), [#allocation3], %s159_s10 }
  0x11   : > { %371 = vmatprep.subr.bf16.mxu0 (!%p140_p9), %v482_v10 }
  0x14   : > { %373 = vmatpush3.bf16.msra.mxu0 (!%p140_p9), %v372_v14 }
  0x15   : > { %s163_s24 = scalar_select %p162_p10, %s527_s16, 1 }
  0x16   : > { %s485_s16 = smov [#allocation2]  }
  0x17   : > { %s345_s25 = sshll.u32 %s163_s24, 3  ;;  %s161_s24 = scalar_lea.vmem [#allocation2], %s344_s11 }
  0x18   : > { %s165_s28 = scalar_lea.vmem %s624_s0, %s345_s25  ;;  %s281_s25 = sshll.u32 %s161_s24, 4  ;;  %s584_s25 = int_to_ptr.vmem [resolvable:$true] %s281_s25 }
  0x19   : > { %v166_v0 = vld [vmem:[%s165_s28] sm:$0xff]  ;;  %s582_s28 = scalar_lea.hbm %s627_s3, %s349_s20  ;;  %s418_s30 = scalar_lea.vmem %s584_s25, 128 }
  0x1a   : > { %v168_v1 = vsel %vm167_vm0, %v166_v0, 0.0  ;;  %p419_p11 = scmp.ne.s32.totalorder %s584_s25, %s418_s30  ;;  %s422_s4 = sshll.u32 %s485_s16, 4  ;;  %s423_s4 = int_to_ptr.vmem [resolvable:$false] %s422_s4 }
  0x1b   : > { %169 = vadd.xlane.f32.xlu0 %v168_v1  ;;  %s424_s5 = scalar_lea.vmem %s423_s4, 256  ;;  %p425_p0 = scmp.lt.s32.totalorder %s584_s25, %s423_s4 }
  0x1c   : > { %p420_p12 = pnand %p419_p11, %p544_p5  ;;  %p426_p1 = scmp.lt.s32.totalorder %s424_s5, %s418_s30 }
  0x1e   : > { %p421_p13 = pneg %p420_p12  ;;  %p427_p2 = por %p426_p1, %p425_p0 }
  0x20   : > { %p428_p3 = pnand %p427_p2, %p421_p13 }
  0xa8   : > { %v170_v2 = vpop.xlane.xlu0 %169 }
  0xa9   : > { %v171_v3 = vmul.f32 0.03125, %v170_v2 }
  0xab   : > { %v172_v4 = vsub.f32 %v166_v0, %v171_v3 }
  0xad   : > { %v173_v5 = vmul.f32 %v172_v4, %v172_v4 }
  0xaf   : > { %v174_v6 = vsel %vm167_vm0, %v173_v5, 0.0 }
  0xb0   : > { %175 = vadd.xlane.f32.xlu0 %v174_v6 }
 0x13d   : > { %v176_v15 = vpop.xlane.xlu0 %175 }
 0x13e   : > { %v177_v16 = vmul.f32 0.03125, %v176_v15 }
 0x140   : > { %v178_v17 = vadd.f32 1e-06, %v177_v16 }
 0x142   : > { %416 = vrsqrt.f32 %v178_v17 }
 0x14c   : > { %v417_v18 = vpop.eup %416 }
 0x14d   : > { %v180_v19 = vmul.f32 %v417_v18, %v172_v4 }
 0x14f   : > { %366 = vmatmul.mubr.msk.f32.vlgmr.msra.gmra.mrb[0].mxu0 %vm167_vm0, %v180_v19 }
 0x222   : > { %v261_v21 = vpop.f32.mrb[0].mxu0 }
 0x223   : > { %v262_v22 = vadd.f32 %v346_v20, %v261_v21  ;;  %v367_v23 = vpop.f32.mrb[1].mxu0 }
 0x225   : > { %266 = vst.msk [vmem:[%s161_s24] sm:$0xff] %vm265_vm2, %v262_v22 }
 0x226   : > { %431 = shalt.err (!%p428_p3)
}
 0x227   : > { %s432_s6 = scalar_lea.hbm %s582_s28, 128  ;;  %s436_s9 = scalar_lea.hbm %s627_s3, 256 }
 0x228   : > { %p433_p4 = scmp.ne.s32.totalorder %s582_s28, %s432_s6  ;;  %p437_p9 = scmp.lt.u32.totalorder %s582_s28, %s627_s3 }
 0x229   : > { %p438_p10 = scmp.lt.u32.totalorder %s436_s9, %s432_s6  ;;  %p440_p12 = scmp.lt.u32.totalorder %s432_s6, %s582_s28 }
 0x22a   : > { %p434_p7 = pnand %p433_p4, %p544_p5 }
 0x22b   : > { %p439_p11 = por %p438_p10, %p437_p9 }
 0x22c   : > { %p435_p8 = pneg %p434_p7 }
 0x22d   : > { %p441_p13 = por %p440_p12, %p439_p11 }
 0x22f   : > { %p442_p0 = pnand %p441_p13, %p435_p8 }
 0x231   : > { %445 = shalt.err (!%p442_p0)
}
 0x232   : > { %374 = dma.vmem_to_hbm [thread:$0]  (%p544_p5), %s584_s25, 128, %s582_s28, %s268_s29  }
 0x233 PF: > { %p380_p1 = scmp.ge.s32.totalorder %s480_s15, 2  ;;  %s293_s17 = sand.u32 1, %s468_s12  }
 0x234   : > { %s294_s19 = scalar_lea.sflag [#allocation3], %s293_s17 }
 0x235   : > { %p377_p2 = pnand %p380_p1, %p548_p6 }
 0x237   : > { %463 = dma.done.wait (!%p377_p2), %s294_s19, 128  }
 0x238   : > { %465 = vsyncadd (!%p377_p2), %s294_s19, 4294967168  ;;  %p13_p3 = scmp.ge.s32.totalorder %s531_s18, 4   ;;  %s630_s12 = smov %s472_s13 }
 0x239   : > { %s631_s13 = smov %s476_s14  ;;  %s632_s14 = smov %s542_s21 }
 0x23a   : > { %s633_s15 = smov %s531_s18  ;;  %15 = sbr.rel (!%p13_p3) target bundleno = 3 (0x3), region = 67 }
 0x241   :  { %299 = vsyncpa [#allocation3], 1 }
 0x242   :  { %301 = vsyncpa [#allocation3 + $0x1], 1 }

// kernel: tpu_custom_call.1
= control target key start
LH: loop header
LB: loop body
LE: loop exit
PB: predicated region body
PF: predicated region fallthrough
CT: control target
= control target key end

     0   :  { %8 = vsyncpa [#allocation3], 0  ;;  %s624_s0 = inlined_call_operand.vmem [shape: f32[16,32], index: 0, kind: input, shape index: {}]   ;;  %s625_s1 = inlined_call_operand.vmem [shape: f32[32,16], index: 1, kind: input, shape index: {}]   ;;  %s626_s2 = inlined_call_operand.vmem [shape: f32[1,16], index: 2, kind: input, shape index: {}]   ;;  %s627_s3 = inlined_call_operand.hbm [shape: f32[16,16], index: 3, kind: output, shape index: {}]  }
   0x1   :  { %10 = vsyncpa [#allocation3 + $0x1], 0  ;;  %s506_s12 = smov 0   ;;  %s508_s13 = smov 0  }
   0x2   :  { %s510_s14 = smov 0   ;;  %s512_s15 = smov 0  }
   0x3 LB: > { %s527_s16 = sadd.s32 4294967295, %s480_s15   ;;  %s340_s17 = sadd.s32 4294967294, %s480_s15   ;;  %s480_s15 = sphi %s512_s15, %s633_s15   ;;  %s476_s14 = sphi %s510_s14, %s632_s14   ;;  %s472_s13 = sphi %s508_s13, %s631_s13   ;;  %s468_s12 = sphi %s506_s12, %s630_s12  }
   0x4   : > { %s531_s18 = sadd.s32 1, %s480_s15   ;;  %s91_s19 = sadd.s32 1, %s476_s14 }
   0x5   : > { %s88_s20 = ssub.s32 %s480_s15, %s531_s18  ;;  %p101_p0 = scmp.ne.s32.totalorder %s476_s14, %s472_s13 }
   0x6   : > { %p89_p1 = scmp.eq.s32.totalorder %s88_s20, 0  ;;  %p102_p2 = scmp.eq.s32.totalorder %s527_s16, 1 }
   0x7   : > { %p107_p3 = scmp.ne.s32.totalorder %s472_s13, %s468_s12  ;;  %p108_p4 = scmp.eq.s32.totalorder %s340_s17, 1 }
   0x8   : > { %s542_s21 = scalar_select %p89_p1, %s476_s14, %s91_s19  }
   0x9   : > { %p544_p5 = por %p102_p2, %p101_p0  ;;  %p548_p6 = por %p108_p4, %p107_p3 }
   0xa   : > { %p343_p7 = scmp.ge.s32.totalorder %s480_s15, 1  ;;  %p139_p8 = scmp.lt.s32.totalorder %s480_s15, 3 }
   0xc   : > { %p140_p9 = pnand %p343_p7, %p139_p8 }
   0xd   : > { %p162_p10 = scmp.lt.s32.totalorder (!%p140_p9), %s527_s16, 1  ;;  %vm167_vm0 = vcmask (!%p140_p9), 261120   ;;  %v181_v7 = vld [vmem:[%s625_s1] sm:$0xff] (!%p140_p9)  ;;  %v182_v8 = vld [vmem:[%s625_s1 + $0x8] sm:$0xff] (!%p140_p9)  ;;  %v183_v9 = vld [vmem:[%s625_s1 + $0x10] sm:$0xff] (!%p140_p9)  ;;  %v482_v10 = vmov (!%p140_p9), 0.0|0.0  }
   0xe   : > { %143 = sbr.rel (%p140_p9) target bundleno = 563 (0x233), region = 32  ;;  %368 = vmatprep.subr.bf16.mxu0 (!%p140_p9), %v482_v10  ;;  %v369_v11 = vpack.c.bf16 (!%p140_p9), %v182_v8, %v181_v7  ;;  %v184_v12 = vld [vmem:[%s625_s1 + $0x18] sm:$0xff] (!%p140_p9)  ;;  %vm483_vm1 = vmmov (!%p140_p9), 0   ;;  %v484_v13 = vmov (!%p140_p9), 0.0   ;;  %s159_s10 = sand.u32 (!%p140_p9), 1, %s472_s13   ;;  %vm265_vm2 = vcmask (!%p140_p9), 130048  }
   0xf   : > { %365 = vmatprep.mubr.msk.f32.mxu0 (!%p140_p9), %vm483_vm1, %v484_v13  ;;  %v372_v14 = vpack.c.bf16 (!%p140_p9), %v184_v12, %v183_v9  ;;  %s344_s11 = sshll.u32 (!%p140_p9), %s159_s10, 3  ;;  %v346_v20 = vld [vmem:[%s626_s2] ss:$0 sm:$0xff] (!%p140_p9)  ;;  %s349_s20 = sshll.u32 (!%p140_p9), %s527_s16, 7 }
  0x10   : > { %370 = vmatpush3.bf16.msra.mxu0 (!%p140_p9), %v369_v11  ;;  %s268_s29 = scalar_lea.sflag (!%p140_p9), [#allocation3], %s159_s10 }
  0x11   : > { %371 = vmatprep.subr.bf16.mxu0 (!%p140_p9), %v482_v10 }
  0x14   : > { %373 = vmatpush3.bf16.msra.mxu0 (!%p140_p9), %v372_v14 }
  0x15   : > { %s163_s24 = scalar_select %p162_p10, %s527_s16, 1 }
  0x16   : > { %s485_s16 = smov [#allocation2]  }
  0x17   : > { %s345_s25 = sshll.u32 %s163_s24, 3  ;;  %s161_s24 = scalar_lea.vmem [#allocation2], %s344_s11 }
  0x18   : > { %s165_s28 = scalar_lea.vmem %s624_s0, %s345_s25  ;;  %s281_s25 = sshll.u32 %s161_s24, 4  ;;  %s584_s25 = int_to_ptr.vmem [resolvable:$true] %s281_s25 }
  0x19   : > { %v166_v0 = vld [vmem:[%s165_s28] sm:$0xff]  ;;  %s582_s28 = scalar_lea.hbm %s627_s3, %s349_s20  ;;  %s418_s30 = scalar_lea.vmem %s584_s25, 128 }
  0x1a   : > { %v168_v1 = vsel %vm167_vm0, %v166_v0, 0.0  ;;  %p419_p11 = scmp.ne.s32.totalorder %s584_s25, %s418_s30  ;;  %s422_s4 = sshll.u32 %s485_s16, 4  ;;  %s423_s4 = int_to_ptr.vmem [resolvable:$false] %s422_s4 }
  0x1b   : > { %169 = vadd.xlane.f32.xlu0 %v168_v1  ;;  %s424_s5 = scalar_lea.vmem %s423_s4, 256  ;;  %p425_p0 = scmp.lt.s32.totalorder %s584_s25, %s423_s4 }
  0x1c   : > { %p420_p12 = pnand %p419_p11, %p544_p5  ;;  %p426_p1 = scmp.lt.s32.totalorder %s424_s5, %s418_s30 }
  0x1e   : > { %p421_p13 = pneg %p420_p12  ;;  %p427_p2 = por %p426_p1, %p425_p0 }
  0x20   : > { %p428_p3 = pnand %p427_p2, %p421_p13 }
  0xa8   : > { %v170_v2 = vpop.xlane.xlu0 %169 }
  0xa9   : > { %v171_v3 = vmul.f32 0.03125, %v170_v2 }
  0xab   : > { %v172_v4 = vsub.f32 %v166_v0, %v171_v3 }
  0xad   : > { %v173_v5 = vmul.f32 %v172_v4, %v172_v4 }
  0xaf   : > { %v174_v6 = vsel %vm167_vm0, %v173_v5, 0.0 }
  0xb0   : > { %175 = vadd.xlane.f32.xlu0 %v174_v6 }
 0x13d   : > { %v176_v15 = vpop.xlane.xlu0 %175 }
 0x13e   : > { %v177_v16 = vmul.f32 0.03125, %v176_v15 }
 0x140   : > { %v178_v17 = vadd.f32 1e-06, %v177_v16 }
 0x142   : > { %416 = vrsqrt.f32 %v178_v17 }
 0x14c   : > { %v417_v18 = vpop.eup %416 }
 0x14d   : > { %v180_v19 = vmul.f32 %v417_v18, %v172_v4 }
 0x14f   : > { %366 = vmatmul.mubr.msk.f32.vlgmr.msra.gmra.mrb[0].mxu0 %vm167_vm0, %v180_v19 }
 0x222   : > { %v261_v21 = vpop.f32.mrb[0].mxu0 }
 0x223   : > { %v262_v22 = vadd.f32 %v346_v20, %v261_v21  ;;  %v367_v23 = vpop.f32.mrb[1].mxu0 }
 0x225   : > { %266 = vst.msk [vmem:[%s161_s24] sm:$0xff] %vm265_vm2, %v262_v22 }
 0x226   : > { %431 = shalt.err (!%p428_p3)
}
 0x227   : > { %s432_s6 = scalar_lea.hbm %s582_s28, 128  ;;  %s436_s9 = scalar_lea.hbm %s627_s3, 256 }
 0x228   : > { %p433_p4 = scmp.ne.s32.totalorder %s582_s28, %s432_s6  ;;  %p437_p9 = scmp.lt.u32.totalorder %s582_s28, %s627_s3 }
 0x229   : > { %p438_p10 = scmp.lt.u32.totalorder %s436_s9, %s432_s6  ;;  %p440_p12 = scmp.lt.u32.totalorder %s432_s6, %s582_s28 }
 0x22a   : > { %p434_p7 = pnand %p433_p4, %p544_p5 }
 0x22b   : > { %p439_p11 = por %p438_p10, %p437_p9 }
 0x22c   : > { %p435_p8 = pneg %p434_p7 }
 0x22d   : > { %p441_p13 = por %p440_p12, %p439_p11 }
 0x22f   : > { %p442_p0 = pnand %p441_p13, %p435_p8 }
 0x231   : > { %445 = shalt.err (!%p442_p0)
}
 0x232   : > { %374 = dma.vmem_to_hbm [thread:$0]  (%p544_p5), %s584_s25, 128, %s582_s28, %s268_s29  }
 0x233 PF: > { %p380_p1 = scmp.ge.s32.totalorder %s480_s15, 2  ;;  %s293_s17 = sand.u32 1, %s468_s12  }
 0x234   : > { %s294_s19 = scalar_lea.sflag [#allocation3], %s293_s17 }
 0x235   : > { %p377_p2 = pnand %p380_p1, %p548_p6 }
 0x237   : > { %463 = dma.done.wait (!%p377_p2), %s294_s19, 128  }
 0x238   : > { %465 = vsyncadd (!%p377_p2), %s294_s19, 4294967168  ;;  %p13_p3 = scmp.ge.s32.totalorder %s531_s18, 4   ;;  %s630_s12 = smov %s472_s13 }
 0x239   : > { %s631_s13 = smov %s476_s14  ;;  %s632_s14 = smov %s542_s21 }
 0x23a   : > { %s633_s15 = smov %s531_s18  ;;  %15 = sbr.rel (!%p13_p3) target bundleno = 3 (0x3), region = 67 }
 0x241   :  { %299 = vsyncpa [#allocation3], 1 }
 0x242   :  { %301 = vsyncpa [#allocation3 + $0x1], 1 }

</bundles_post_ra>
